<compile_context>
chip_gen: v6e
topology: v6e:2x2x1
jax: 0.10.0
libtpu: 0.0.40
codegen_flags: <defaults>
</compile_context>

<pallas_src>
import functools
import math

import jax
import jax.numpy as jnp
from jax.experimental import pallas as pl
from jax.experimental.pallas import tpu as pltpu


def _round_up(x, m):
    return ((x + m - 1) // m) * m


def _dropout_threshold(keep_prob):
    # uint32 threshold: keep iff bits < threshold  (P(keep) = keep_prob to 2^-32)
    return min(int(keep_prob * float(1 << 32)), (1 << 32) - 1)


def _make_kernel(apply_dropout, threshold, inv_keep):
    """Build the tiled matmul kernel (optionally with dropout masking of x)."""

    def kernel(*refs):
        if apply_dropout:
            bits_ref, x_ref, wt_ref, o_ref, acc_ref = refs
        else:
            x_ref, wt_ref, o_ref, acc_ref = refs

        k = pl.program_id(2)

        @pl.when(k == 0)
        def _():
            acc_ref[...] = jnp.zeros_like(acc_ref)

        x = x_ref[...]
        if apply_dropout:
            keep = bits_ref[...] < jnp.uint32(threshold)
            x = jnp.where(keep, x, jnp.zeros_like(x))

        # Native-dtype operands straight to the MXU, f32 accumulation.
        acc_ref[...] += jnp.dot(x, wt_ref[...], preferred_element_type=jnp.float32)

        @pl.when(k == pl.num_programs(2) - 1)
        def _():
            out = acc_ref[...]
            if inv_keep != 1.0:
                out = out * inv_keep  # fold 1/keep_prob into the output tile
            o_ref[...] = out.astype(o_ref.dtype)

    return kernel


def fully_connected_concatenated_layer(
    x, weight, *, dropout_rate=0.1, training=False, rng_key=None
):
    """y = Linear(Dropout(x)), Linear bias=False.

    x:      [..., in_features]
    weight: [out_features, in_features]  (PyTorch nn.Linear layout)
    """
    *lead, K = x.shape
    N, K_w = weight.shape
    assert K == K_w, "feature dim mismatch"
    M = math.prod(lead) if lead else 1

    apply_dropout = bool(training) and float(dropout_rate) > 0.0
    keep_prob = 1.0 - float(dropout_rate)
    inv_keep = 1.0 / keep_prob if apply_dropout else 1.0
    threshold = _dropout_threshold(keep_prob) if apply_dropout else 0

    # Tile sizes: MXU/lane friendly, capped so double-buffered working set
    # stays a few MiB (safe on v7x's 64 MiB VMEM as well as v5e/v6e's 128 MiB).
    tm = min(256, _round_up(M, 8))
    tk = min(512, _round_up(K, 128))
    tn = min(512, _round_up(N, 128))
    Mp, Kp, Np = _round_up(M, tm), _round_up(K, tk), _round_up(N, tn)

    x2d = jnp.pad(x.reshape(M, K), ((0, Mp - M), (0, Kp - K)))
    # TODO(synk): in a real model, pre-transpose/pad the weight once at init
    # instead of per call.
    wt = jnp.pad(weight.T, ((0, Kp - K), (0, Np - N)))  # (Kp, Np)

    grid = (Mp // tm, Np // tn, Kp // tk)

    in_specs = []
    operands = []
    if apply_dropout:
        if rng_key is None:
            rng_key = jax.random.PRNGKey(0)
        # One uint32 per logical x element; tiled identically to x, so every
        # element is masked exactly once regardless of the K tiling.
        bits2d = jnp.pad(
            jax.random.bits(rng_key, x.shape, dtype=jnp.uint32).reshape(M, K),
            ((0, Mp - M), (0, Kp - K)),
        )
        in_specs.append(pl.BlockSpec((tm, tk), lambda i, j, k: (i, k)))
        operands.append(bits2d)

    in_specs += [
        pl.BlockSpec((tm, tk), lambda i, j, k: (i, k)),  # x tile
        pl.BlockSpec((tk, tn), lambda i, j, k: (k, j)),  # W^T tile
    ]
    operands += [x2d, wt]

    bytes_accessed = (
        x2d.size * x2d.dtype.itemsize
        + wt.size * wt.dtype.itemsize
        + Mp * Np * x.dtype.itemsize
        + (x2d.size * 4 if apply_dropout else 0)
    )

    out2d = pl.pallas_call(
        _make_kernel(apply_dropout, threshold, inv_keep),
        out_shape=jax.ShapeDtypeStruct((Mp, Np), x.dtype),
        grid=grid,
        in_specs=in_specs,
        out_specs=pl.BlockSpec((tm, tn), lambda i, j, k: (i, j)),
        scratch_shapes=[pltpu.VMEM((tm, tn), jnp.float32)],
        compiler_params=pltpu.CompilerParams(
            dimension_semantics=("parallel", "parallel", "arbitrary"),
        ),
        cost_estimate=pl.CostEstimate(
            flops=2 * Mp * Np * Kp,
            transcendentals=0,
            bytes_accessed=bytes_accessed,
        ),
    )(*operands)

    return out2d[:M, :N].reshape(*lead, N)


def _xavier_uniform(key, out_features, in_features, dtype=jnp.float32):
    """Matches torch.nn.init.xavier_uniform_ bound = sqrt(6/(fan_in+fan_out))."""
    bound = (6.0 / (in_features + out_features)) ** 0.5
    return jax.random.uniform(
        key, (out_features, in_features), dtype=dtype, minval=-bound, maxval=bound
    )


if __name__ == "__main__":
    # Small shapes implied by the module: batch=2, seq=8, hidden(in)=32, out=64.
    batch, seq, in_features, out_features = 2, 8, 32, 64
    dropout_rate = 0.1

    key = jax.random.PRNGKey(0)
    kx, kw, kd = jax.random.split(key, 3)

    x = jax.random.normal(kx, (batch, seq, in_features), dtype=jnp.float32)
    weight = _xavier_uniform(kw, out_features, in_features)

    # ---- Eval-mode forward (dropout == identity), matches module.eval(). ----
    y = fully_connected_concatenated_layer(
        x, weight, dropout_rate=dropout_rate, training=False
    )
    y = jax.block_until_ready(y)
    y_ref = x.reshape(-1, in_features) @ weight.T
    assert y.shape == (batch, seq, out_features)
    assert jnp.allclose(y.reshape(-1, out_features), y_ref, atol=1e-5, rtol=1e-5)

    # ---- Training-mode forward (inverted dropout), exact reproducible check. ----
    y_train = fully_connected_concatenated_layer(
        x, weight, dropout_rate=dropout_rate, training=True, rng_key=kd
    )
    y_train = jax.block_until_ready(y_train)
    keep_prob = 1.0 - dropout_rate
    thr = jnp.uint32(_dropout_threshold(keep_prob))
    keep = jax.random.bits(kd, x.shape, dtype=jnp.uint32) < thr
    x_dropped = jnp.where(keep, x, 0.0)
    y_train_ref = (x_dropped.reshape(-1, in_features) @ weight.T) / keep_prob
    assert y_train.shape == (batch, seq, out_features)
    assert jnp.allclose(
        y_train.reshape(-1, out_features), y_train_ref, atol=1e-4, rtol=1e-4
    )

    print("KERNEL_OK")
</pallas_src>

<mosaic_0001>
module attributes {stable_mosaic.version = 11 : i64} {
  func.func @kernel(%arg0: i32, %arg1: i32, %arg2: i32, %arg3: memref<16x128xf32, #tpu.memory_space<vmem>>, %arg4: memref<128x128xf32, #tpu.memory_space<vmem>>, %arg5: memref<16x128xf32, #tpu.memory_space<vmem>>, %arg6: memref<16x128xf32, #tpu.memory_space<vmem>>) attributes {dimension_semantics = [#tpu.dimension_semantics<parallel>, #tpu.dimension_semantics<parallel>, #tpu.dimension_semantics<arbitrary>], iteration_bounds = array<i64: 1, 1, 1>, scalar_prefetch = 0 : i64, scratch_operands = 1 : i64, tpu.core_type = #tpu.core_type<tc>, window_params = [{transform_indices = @transform_0, window_bounds = array<i64: 16, 128>}, {transform_indices = @transform_1, window_bounds = array<i64: 128, 128>}, {transform_indices = @transform_2, window_bounds = array<i64: 16, 128>}]} {
    %c0_i32 = arith.constant 0 : i32
    %0 = arith.cmpi eq, %arg2, %c0_i32 : i32
    %1 = arith.extui %0 : i1 to i32
    %c0_i32_0 = arith.constant 0 : i32
    %2 = arith.cmpi ne, %1, %c0_i32_0 : i32
    scf.if %2 {
      %cst_10 = arith.constant 0.000000e+00 : f32
      %12 = vector.broadcast %cst_10 : f32 to vector<16x128xf32>
      %c0_11 = arith.constant 0 : index
      %c0_12 = arith.constant 0 : index
      %13 = vector.load %arg6[%c0_11, %c0_12] : memref<16x128xf32, #tpu.memory_space<vmem>>, vector<16x128xf32>
      tpu.vector_store %arg6[%c0_11, %c0_12], %12 {strides = array<i32>} : memref<16x128xf32, #tpu.memory_space<vmem>>, vector<16x128xf32>,
    } else {
    }
    %c0 = arith.constant 0 : index
    %c0_1 = arith.constant 0 : index
    %3 = vector.load %arg3[%c0, %c0_1] : memref<16x128xf32, #tpu.memory_space<vmem>>, vector<16x128xf32>
    %c0_2 = arith.constant 0 : index
    %c0_3 = arith.constant 0 : index
    %4 = vector.load %arg6[%c0_2, %c0_3] : memref<16x128xf32, #tpu.memory_space<vmem>>, vector<16x128xf32>
    %c0_4 = arith.constant 0 : index
    %c0_5 = arith.constant 0 : index
    %5 = vector.load %arg4[%c0_4, %c0_5] : memref<128x128xf32, #tpu.memory_space<vmem>>, vector<128x128xf32>
    %cst = arith.constant dense<0.000000e+00> : vector<16x128xf32>
    %6 = tpu.matmul %3, %5, %cst {dimension_numbers = #tpu.dot_dimension_numbers<[1], [0], [0], [1], [0, 0, 1, 1], [], []>} : vector<16x128xf32>, vector<128x128xf32>, vector<16x128xf32> -> vector<16x128xf32>
    %7 = arith.addf %4, %6 : vector<16x128xf32>
    %c0_6 = arith.constant 0 : index
    %c0_7 = arith.constant 0 : index
    %8 = vector.load %arg6[%c0_6, %c0_7] : memref<16x128xf32, #tpu.memory_space<vmem>>, vector<16x128xf32>
    tpu.vector_store %arg6[%c0_6, %c0_7], %7 {strides = array<i32>} : memref<16x128xf32, #tpu.memory_space<vmem>>, vector<16x128xf32>,
    %c0_i32_8 = arith.constant 0 : i32
    %9 = arith.cmpi eq, %arg2, %c0_i32_8 : i32
    %10 = arith.extui %9 : i1 to i32
    %c0_i32_9 = arith.constant 0 : i32
    %11 = arith.cmpi ne, %10, %c0_i32_9 : i32
    scf.if %11 {
      %c0_10 = arith.constant 0 : index
      %c0_11 = arith.constant 0 : index
      %12 = vector.load %arg6[%c0_10, %c0_11] : memref<16x128xf32, #tpu.memory_space<vmem>>, vector<16x128xf32>
      %c0_12 = arith.constant 0 : index
      %c0_13 = arith.constant 0 : index
      %13 = vector.load %arg5[%c0_12, %c0_13] : memref<16x128xf32, #tpu.memory_space<vmem>>, vector<16x128xf32>
      tpu.vector_store %arg5[%c0_12, %c0_13], %12 {strides = array<i32>} : memref<16x128xf32, #tpu.memory_space<vmem>>, vector<16x128xf32>,
    } else {
    }
    return
  }
  func.func @transform_0(%arg0: i32, %arg1: i32, %arg2: i32) -> (i32, i32) {
    %c0_i32 = arith.constant 0 : i32
    return %arg0, %arg2 : i32, i32
  }
  func.func @transform_1(%arg0: i32, %arg1: i32, %arg2: i32) -> (i32, i32) {
    %c0_i32 = arith.constant 0 : i32
    return %arg2, %arg1 : i32, i32
  }
  func.func @transform_2(%arg0: i32, %arg1: i32, %arg2: i32) -> (i32, i32) {
    %c0_i32 = arith.constant 0 : i32
    return %arg0, %arg1 : i32, i32
  }
}

</mosaic_0001>

<bundles_post_ra>
// kernel: tpu_custom_call.1
= control target key start
LH: loop header
LB: loop body
LE: loop exit
PB: predicated region body
PF: predicated region fallthrough
CT: control target
= control target key end

     0   :  { %7 = vsyncpa [#allocation4], 0  ;;  %s332_s0 = inlined_call_operand.hbm [shape: f32[16,128], index: 0, kind: input, shape index: {}]   ;;  %s333_s1 = inlined_call_operand.hbm [shape: f32[128,128], index: 1, kind: input, shape index: {}]   ;;  %s334_s2 = inlined_call_operand.hbm [shape: f32[16,128], index: 2, kind: output, shape index: {}]  }
   0x1   :  { %8 = vsyncpa [#allocation7], 0 }
   0x2   :  { %9 = vsyncpa [#allocation5], 0  ;;  %s294_s9 = smov [#allocation3]  }
   0x3   :  { %s15_s10 = sshll.u32 %s294_s9, 4  ;;  %s16_s10 = int_to_ptr.vmem [resolvable:$true] %s15_s10 }
   0x4   :  { %s236_s11 = scalar_lea.vmem %s16_s10, 256  ;;  %p241_p1 = scmp.lt.s32.totalorder %s16_s10, %s16_s10 }
   0x5   :  { %p237_p0 = scmp.ne.s32.totalorder %s16_s10, %s236_s11  ;;  %p242_p2 = scmp.lt.s32.totalorder %s236_s11, %s236_s11 }
   0x7   :  { %p243_p3 = por %p242_p2, %p241_p1 }
   0x9   :  { %p244_p4 = pnand %p243_p3, %p237_p0 }
   0xb   :  { %247 = shalt.err (!%p244_p4)
}
   0xc   :  { %s295_s12 = smov 128   ;;  %s296_s13 = smov 8  }
   0xd   :  { %21 = dma.hbm_to_vmem [thread:$0]  %s332_s0, 256, %s16_s10, [#allocation4], %s295_s12, %s295_s12, %s296_s13  }
   0xe   :  { %s297_s16 = smov [#allocation6]  }
   0xf   :  { %s27_s17 = sshll.u32 %s297_s16, 4  ;;  %s28_s17 = int_to_ptr.vmem [resolvable:$true] %s27_s17 }
  0x10   :  { %s256_s18 = scalar_lea.vmem %s28_s17, 2048  ;;  %p261_p6 = scmp.lt.s32.totalorder %s28_s17, %s28_s17 }
  0x11   :  { %p257_p5 = scmp.ne.s32.totalorder %s28_s17, %s256_s18  ;;  %p262_p7 = scmp.lt.s32.totalorder %s256_s18, %s256_s18 }
  0x13   :  { %p263_p8 = por %p262_p7, %p261_p6 }
  0x15   :  { %p264_p9 = pnand %p263_p8, %p257_p5 }
  0x17   :  { %267 = shalt.err (!%p264_p9)
}
  0x18   :  { %33 = dma.hbm_to_vmem [thread:$0]  %s333_s1, 2048, %s28_s17, [#allocation7], %s295_s12, %s295_s12, %s296_s13  }
  0x19   :  { %288 = dma.done.wait [#allocation4], 256  }
  0x1a   :  { %289 = vsyncadd [#allocation4], 4294967040 }
  0x1b   :  { %290 = dma.done.wait [#allocation7], 2048  }
  0x1c   :  { %291 = vsyncadd [#allocation7], 4294965248  ;;  %v65_v0 = vld [vmem:[#allocation6 + $0x78] sm:$0xff]  ;;  %v64_v1 = vld [vmem:[#allocation6 + $0x70] sm:$0xff]  ;;  %s298_s0 = smov [#allocation8]  }
  0x1d   :  { %188 = vmatprep.subr.mxu0 %v65_v0  ;;  %v63_v2 = vld [vmem:[#allocation6 + $0x68] sm:$0xff]  ;;  %v62_v3 = vld [vmem:[#allocation6 + $0x60] sm:$0xff]  ;;  %v46_v4 = vld [vmem:[#allocation3] sm:$0xff]  ;;  %s157_s1 = sshll.u32 %s298_s0, 4  ;;  %s158_s1 = int_to_ptr.vmem [resolvable:$true] %s157_s1 }
  0x1e   :  { %189 = vmatpush3.msra.mxu0 %v65_v0  ;;  %v61_v5 = vld [vmem:[#allocation6 + $0x58] sm:$0xff]  ;;  %220 = vmatprep.mubr.f32.mxu0 %v46_v4  ;;  %v60_v6 = vld [vmem:[#allocation6 + $0x50] sm:$0xff]  ;;  %v59_v7 = vld [vmem:[#allocation6 + $0x48] sm:$0xff]  ;;  %s268_s21 = scalar_lea.vmem %s158_s1, 256  ;;  %p273_p11 = scmp.lt.s32.totalorder %s158_s1, %s158_s1 }
  0x1f   :  { %190 = vmatprep.subr.mxu0 %v64_v1  ;;  %v58_v8 = vld [vmem:[#allocation6 + $0x40] sm:$0xff]  ;;  %v57_v9 = vld [vmem:[#allocation6 + $0x38] sm:$0xff]  ;;  %v56_v10 = vld [vmem:[#allocation6 + $0x30] sm:$0xff]  ;;  %p269_p10 = scmp.ne.s32.totalorder %s158_s1, %s268_s21  ;;  %p274_p12 = scmp.lt.s32.totalorder %s268_s21, %s268_s21 }
  0x20   :  { %191 = vmatpush3.msra.mxu0 %v64_v1  ;;  %v55_v11 = vld [vmem:[#allocation6 + $0x28] sm:$0xff]  ;;  %v54_v12 = vld [vmem:[#allocation6 + $0x20] sm:$0xff]  ;;  %v53_v13 = vld [vmem:[#allocation6 + $0x18] sm:$0xff] }
  0x21   :  { %192 = vmatprep.subr.mxu0 %v63_v2  ;;  %v52_v14 = vld [vmem:[#allocation6 + $0x10] sm:$0xff]  ;;  %v51_v15 = vld [vmem:[#allocation6 + $0x8] sm:$0xff]  ;;  %v50_v16 = vld [vmem:[#allocation6] sm:$0xff]  ;;  %p275_p13 = por %p274_p12, %p273_p11 }
  0x22   :  { %193 = vmatpush3.msra.mxu0 %v63_v2  ;;  %v47_v17 = vld [vmem:[#allocation3 + $0x8] sm:$0xff] }
  0x23   :  { %194 = vmatprep.subr.mxu0 %v62_v3  ;;  %p276_p0 = pnand %p275_p13, %p269_p10 }
  0x24   :  { %195 = vmatpush3.msra.mxu0 %v62_v3 }
  0x25   :  { %196 = vmatprep.subr.mxu0 %v61_v5 }
  0x26   :  { %197 = vmatpush3.msra.mxu0 %v61_v5 }
  0x27   :  { %198 = vmatprep.subr.mxu0 %v60_v6 }
  0x28   :  { %199 = vmatpush3.msra.mxu0 %v60_v6 }
  0x29   :  { %200 = vmatprep.subr.mxu0 %v59_v7 }
  0x2a   :  { %201 = vmatpush3.msra.mxu0 %v59_v7 }
  0x2b   :  { %202 = vmatprep.subr.mxu0 %v58_v8 }
  0x2c   :  { %203 = vmatpush3.msra.mxu0 %v58_v8 }
  0x2d   :  { %204 = vmatprep.subr.mxu0 %v57_v9 }
  0x2e   :  { %205 = vmatpush3.msra.mxu0 %v57_v9 }
  0x2f   :  { %206 = vmatprep.subr.mxu0 %v56_v10 }
  0x30   :  { %207 = vmatpush3.msra.mxu0 %v56_v10 }
  0x31   :  { %208 = vmatprep.subr.mxu0 %v55_v11 }
  0x32   :  { %209 = vmatpush3.msra.mxu0 %v55_v11 }
  0x33   :  { %210 = vmatprep.subr.mxu0 %v54_v12 }
  0x34   :  { %211 = vmatpush3.msra.mxu0 %v54_v12 }
  0x35   :  { %212 = vmatprep.subr.mxu0 %v53_v13 }
  0x36   :  { %213 = vmatpush3.msra.mxu0 %v53_v13 }
  0x37   :  { %214 = vmatprep.subr.mxu0 %v52_v14 }
  0x38   :  { %215 = vmatpush3.msra.mxu0 %v52_v14 }
  0x39   :  { %216 = vmatprep.subr.mxu0 %v51_v15 }
  0x3a   :  { %217 = vmatpush3.msra.mxu0 %v51_v15 }
  0x3b   :  { %218 = vmatprep.subr.mxu0 %v50_v16 }
  0x3c   :  { %219 = vmatpush3.msra.mxu0 %v50_v16 }
  0x3d   :  { %221 = vmatmul.mubr.f32.vlgmr.msra.gmra.mxu0 %v47_v17 }
  0xfd   :  { %v222_v18 = vpop.f32.mrf.mxu0 }
  0xfe   :  { %151 = vst [vmem:[#allocation8 + $0x8] sm:$0xff] %v222_v18 }
  0xff   :  { %v132_v19 = vpop.f32.mrf.mxu0 }
 0x100   :  { %150 = vst [vmem:[#allocation8] sm:$0xff] %v132_v19 }
 0x101   :  { %279 = shalt.err (!%p276_p0)
}
 0x102   :  { %163 = dma.vmem_to_hbm [thread:$0]  %s158_s1, 256, %s334_s2, [#allocation5], %s295_s12, %s295_s12, %s296_s13  }
 0x103   :  { %292 = dma.done.wait [#allocation5], 256  }
 0x104   :  { %293 = vsyncadd [#allocation5], 4294967040 }
 0x105   :  { %167 = vsyncpa [#allocation4], 1 }
 0x106   :  { %168 = vsyncpa [#allocation7], 1 }
 0x107   :  { %169 = vsyncpa [#allocation5], 1 }

</bundles_post_ra>
